<compile_context>
chip_gen: v6e
topology: v6e:2x2x1
jax: 0.10.0
libtpu: 0.0.40
codegen_flags: <defaults>
</compile_context>

<pallas_src>
import functools

import jax
import jax.numpy as jnp
from jax import lax
from jax.experimental import pallas as pl
from jax.experimental.pallas import tpu as pltpu


def _round_up(a, m):
    return -(-a // m) * m


def _mlp_kernel(x_ref,
                w1_ref, b1_ref,
                w2_ref, b2_ref,
                w3_ref, b3_ref,
                w4_ref, b4_ref,
                o_ref, *, act_dtype):
    # x arrives as raw f32; cast to bf16 in-kernel (avoids a separate,
    # un-hidden XLA cast pass over the dominant HBM stream).
    x = x_ref[...].astype(jnp.bfloat16)                          # (TILE_B, 13)

    # fc1 + ReLU (dropout is identity in eval mode). f32 MXU accumulation,
    # activations in act_dtype (bf16 on v6e/v7x, f32 on v5e and earlier).
    h = jnp.dot(x, w1_ref[...], preferred_element_type=jnp.float32)
    h = jnp.maximum(h.astype(act_dtype) + b1_ref[...], 0)        # (TILE_B, 128)

    # fc2 + ReLU
    h = jnp.dot(h.astype(jnp.bfloat16), w2_ref[...],
                preferred_element_type=jnp.float32)
    h = jnp.maximum(h.astype(act_dtype) + b2_ref[...], 0)        # (TILE_B, 64)

    # fc3 + ReLU
    h = jnp.dot(h.astype(jnp.bfloat16), w3_ref[...],
                preferred_element_type=jnp.float32)
    h = jnp.maximum(h.astype(act_dtype) + b3_ref[...], 0)        # (TILE_B, 32)

    # fc4 computed transposed so the stored result is lane-dense:
    # (1,32) . (TILE_B,32)^T -> (1, TILE_B).
    z = lax.dot_general(w4_ref[...], h.astype(jnp.bfloat16),
                        (((1,), (1,)), ((), ())),
                        preferred_element_type=jnp.float32)      # (1, TILE_B)
    z = z + b4_ref[0, 0]                                         # SMEM scalar bias

    # sigmoid: exp on EUP + approx EUP reciprocal (VALU slots stay free).
    o_ref[...] = pl.reciprocal(1.0 + jnp.exp(-z), approx=True)

    # TODO(synk): Dropout(p=0.3) training-mode stochastic masking is omitted;
    #             eval-mode semantics (identity) are reproduced exactly.


def _block_spec(shape, index_map, *, buffered=None):
    """BlockSpec builder; degrades gracefully if pipeline_mode is unsupported."""
    if buffered is not None:
        try:
            return pl.BlockSpec(shape, index_map,
                                pipeline_mode=pl.Buffered(buffered))
        except TypeError:
            pass
    return pl.BlockSpec(shape, index_map)


def _vpu_has_bf16():
    """bf16 VALUs exist on v6e/v7x; keep f32 elementwise on v5 and earlier."""
    try:
        kind = jax.devices()[0].device_kind.lower()
    except Exception:
        return True
    return not any(tag in kind for tag in ("v2", "v3", "v4", "v5"))


def improved_attack_model_forward(x, params, *, max_tile_b=4096):
    """x: (B, input_size) float32; params: dict of f32 weights/biases."""
    B, f_in = x.shape

    # Batch tile: one step for small batches (block == full array, so any
    # multiple of 8 is legal); otherwise a multiple of 128 (lane-dense output
    # blocks) sized so the grid has >=2 steps (both v7x TensorCores get work).
    if B <= max_tile_b:
        tile_b = _round_up(B, 8)
    else:
        tile_b = min(max_tile_b, _round_up(_round_up(B, 2) // 2, 128))
    b_pad = _round_up(B, tile_b)
    num_steps = b_pad // tile_b

    # x stays f32 (cast happens in-kernel); pad only when the tile doesn't
    # divide B.
    x_in = x if b_pad == B else jnp.pad(x, ((0, b_pad - B), (0, 0)))

    act_dtype = jnp.bfloat16 if _vpu_has_bf16() else jnp.float32

    # NOTE: if params are reused across many calls, cache these casts.
    w1 = params["w1"].astype(jnp.bfloat16)
    w2 = params["w2"].astype(jnp.bfloat16)
    w3 = params["w3"].astype(jnp.bfloat16)
    w4 = params["w4"].reshape(1, -1).astype(jnp.bfloat16)        # (1, 32)
    b1 = params["b1"].reshape(1, -1).astype(act_dtype)
    b2 = params["b2"].reshape(1, -1).astype(act_dtype)
    b3 = params["b3"].reshape(1, -1).astype(act_dtype)
    b4 = params["b4"].reshape(1, 1).astype(jnp.float32)          # SMEM scalar

    def resident(arr):
        # Constant block index -> DMA'd once, stays resident in VMEM.
        return pl.BlockSpec(arr.shape, lambda i: (0, 0))

    out = pl.pallas_call(
        functools.partial(_mlp_kernel, act_dtype=act_dtype),
        out_shape=jax.ShapeDtypeStruct((1, b_pad), jnp.float32),
        grid=(num_steps,),
        in_specs=[
            _block_spec((tile_b, f_in), lambda i: (i, 0),
                        buffered=3 if num_steps > 2 else None),
            resident(w1), resident(b1),
            resident(w2), resident(b2),
            resident(w3), resident(b3),
            resident(w4),
            pl.BlockSpec(memory_space=pltpu.MemorySpace.SMEM),   # b4 scalar
        ],
        out_specs=pl.BlockSpec((1, tile_b), lambda i: (0, i)),
        compiler_params=pltpu.CompilerParams(
            dimension_semantics=("parallel",),
        ),
    )(x_in, w1, b1, w2, b2, w3, b3, w4, b4)

    return out[0, :B].reshape(B, 1)


def init_params(key, input_size=13):
    """Deterministic init mirroring PyTorch nn.Linear default (uniform +-1/sqrt(fan_in))."""
    dims = [(input_size, 128), (128, 64), (64, 32), (32, 1)]
    params = {}
    for i, (fan_in, fan_out) in enumerate(dims, start=1):
        key, kw, kb = jax.random.split(key, 3)
        bound = 1.0 / jnp.sqrt(jnp.float32(fan_in))
        params[f"w{i}"] = jax.random.uniform(
            kw, (fan_in, fan_out), jnp.float32, minval=-bound, maxval=bound)
        params[f"b{i}"] = jax.random.uniform(
            kb, (1, fan_out), jnp.float32, minval=-bound, maxval=bound)
    return params


def reference_forward(x, params):
    h = jnp.maximum(x @ params["w1"] + params["b1"], 0.0)
    h = jnp.maximum(h @ params["w2"] + params["b2"], 0.0)
    h = jnp.maximum(h @ params["w3"] + params["b3"], 0.0)
    return jax.nn.sigmoid(h @ params["w4"] + params["b4"].reshape(1, 1))


if __name__ == "__main__":
    key = jax.random.PRNGKey(0)
    key, kx, kx2 = jax.random.split(key, 3)

    B, INPUT_SIZE = 10, 13      # B not a multiple of 8 -> exercises padding
    x = jax.random.normal(kx, (B, INPUT_SIZE), dtype=jnp.float32)
    params = init_params(key, input_size=INPUT_SIZE)

    out = improved_attack_model_forward(x, params)
    out = jax.block_until_ready(out)
    ref = reference_forward(x, params)
    assert out.shape == (B, 1), out.shape
    # bf16 matmul operands / activations + approx reciprocal -> bf16-level tol.
    assert jnp.allclose(out, ref, atol=3e-2, rtol=3e-2), (out, ref)

    # Second small check exercising the multi-step grid (lane-dense tiled
    # output, deeper x pipelining, batch padding) with a reduced tile cap.
    B2 = 600
    x2 = jax.random.normal(kx2, (B2, INPUT_SIZE), dtype=jnp.float32)
    out2 = improved_attack_model_forward(x2, params, max_tile_b=256)
    out2 = jax.block_until_ready(out2)
    ref2 = reference_forward(x2, params)
    assert out2.shape == (B2, 1), out2.shape
    assert jnp.allclose(out2, ref2, atol=3e-2, rtol=3e-2)

    print("KERNEL_OK")
</pallas_src>

<mosaic_0001>
module attributes {stable_mosaic.version = 11 : i64} {
  func.func @_mlp_kernel(%arg0: i32, %arg1: memref<16x13xf32, #tpu.memory_space<vmem>>, %arg2: memref<13x128xbf16, #tpu.memory_space<vmem>>, %arg3: memref<1x128xbf16, #tpu.memory_space<vmem>>, %arg4: memref<128x64xbf16, #tpu.memory_space<vmem>>, %arg5: memref<1x64xbf16, #tpu.memory_space<vmem>>, %arg6: memref<64x32xbf16, #tpu.memory_space<vmem>>, %arg7: memref<1x32xbf16, #tpu.memory_space<vmem>>, %arg8: memref<1x32xbf16, #tpu.memory_space<vmem>>, %arg9: memref<1x1xf32, #tpu.memory_space<smem>>, %arg10: memref<1x16xf32, #tpu.memory_space<vmem>>) attributes {dimension_semantics = [#tpu.dimension_semantics<parallel>], iteration_bounds = array<i64: 1>, scalar_prefetch = 0 : i64, scratch_operands = 0 : i64, tpu.core_type = #tpu.core_type<tc>, window_params = [{transform_indices = @transform_0, window_bounds = array<i64: 16, 13>}, {pipeline_mode = #tpu.pipeline_mode<synchronous>, transform_indices = @transform_1, window_bounds = array<i64: 13, 128>}, {pipeline_mode = #tpu.pipeline_mode<synchronous>, transform_indices = @transform_2, window_bounds = array<i64: 1, 128>}, {pipeline_mode = #tpu.pipeline_mode<synchronous>, transform_indices = @transform_3, window_bounds = array<i64: 128, 64>}, {pipeline_mode = #tpu.pipeline_mode<synchronous>, transform_indices = @transform_4, window_bounds = array<i64: 1, 64>}, {pipeline_mode = #tpu.pipeline_mode<synchronous>, transform_indices = @transform_5, window_bounds = array<i64: 64, 32>}, {pipeline_mode = #tpu.pipeline_mode<synchronous>, transform_indices = @transform_6, window_bounds = array<i64: 1, 32>}, {pipeline_mode = #tpu.pipeline_mode<synchronous>, transform_indices = @transform_7, window_bounds = array<i64: 1, 32>}, {transform_indices = @transform_8, window_bounds = array<i64: 1, 1>}, {transform_indices = @transform_9, window_bounds = array<i64: 1, 16>}]} {
    %c0 = arith.constant 0 : index
    %c0_0 = arith.constant 0 : index
    %0 = vector.load %arg1[%c0, %c0_0] : memref<16x13xf32, #tpu.memory_space<vmem>>, vector<16x13xf32>
    %1 = arith.truncf %0 : vector<16x13xf32> to vector<16x13xbf16>
    %c0_1 = arith.constant 0 : index
    %c0_2 = arith.constant 0 : index
    %2 = vector.load %arg2[%c0_1, %c0_2] : memref<13x128xbf16, #tpu.memory_space<vmem>>, vector<13x128xbf16>
    %cst = arith.constant dense<0.000000e+00> : vector<16x128xf32>
    %3 = tpu.matmul %1, %2, %cst {dimension_numbers = #tpu.dot_dimension_numbers<[1], [0], [0], [1], [0, 0, 1, 1], [], []>} : vector<16x13xbf16>, vector<13x128xbf16>, vector<16x128xf32> -> vector<16x128xf32>
    %4 = arith.truncf %3 : vector<16x128xf32> to vector<16x128xbf16>
    %c0_3 = arith.constant 0 : index
    %c0_4 = arith.constant 0 : index
    %5 = vector.load %arg3[%c0_3, %c0_4] : memref<1x128xbf16, #tpu.memory_space<vmem>>, vector<1x128xbf16>
    %6 = vector.broadcast %5 : vector<1x128xbf16> to vector<16x128xbf16>
    %7 = arith.addf %4, %6 : vector<16x128xbf16>
    %cst_5 = arith.constant 0.000000e+00 : bf16
    %8 = vector.broadcast %cst_5 : bf16 to vector<16x128xbf16>
    %9 = arith.maximumf %7, %8 : vector<16x128xbf16>
    %c0_6 = arith.constant 0 : index
    %c0_7 = arith.constant 0 : index
    %10 = vector.load %arg4[%c0_6, %c0_7] : memref<128x64xbf16, #tpu.memory_space<vmem>>, vector<128x64xbf16>
    %cst_8 = arith.constant dense<0.000000e+00> : vector<16x64xf32>
    %11 = tpu.matmul %9, %10, %cst_8 {dimension_numbers = #tpu.dot_dimension_numbers<[1], [0], [0], [1], [0, 0, 1, 1], [], []>} : vector<16x128xbf16>, vector<128x64xbf16>, vector<16x64xf32> -> vector<16x64xf32>
    %12 = arith.truncf %11 : vector<16x64xf32> to vector<16x64xbf16>
    %c0_9 = arith.constant 0 : index
    %c0_10 = arith.constant 0 : index
    %13 = vector.load %arg5[%c0_9, %c0_10] : memref<1x64xbf16, #tpu.memory_space<vmem>>, vector<1x64xbf16>
    %14 = vector.broadcast %13 : vector<1x64xbf16> to vector<16x64xbf16>
    %15 = arith.addf %12, %14 : vector<16x64xbf16>
    %cst_11 = arith.constant 0.000000e+00 : bf16
    %16 = vector.broadcast %cst_11 : bf16 to vector<16x64xbf16>
    %17 = arith.maximumf %15, %16 : vector<16x64xbf16>
    %c0_12 = arith.constant 0 : index
    %c0_13 = arith.constant 0 : index
    %18 = vector.load %arg6[%c0_12, %c0_13] : memref<64x32xbf16, #tpu.memory_space<vmem>>, vector<64x32xbf16>
    %cst_14 = arith.constant dense<0.000000e+00> : vector<16x32xf32>
    %19 = tpu.matmul %17, %18, %cst_14 {dimension_numbers = #tpu.dot_dimension_numbers<[1], [0], [0], [1], [0, 0, 1, 1], [], []>} : vector<16x64xbf16>, vector<64x32xbf16>, vector<16x32xf32> -> vector<16x32xf32>
    %20 = arith.truncf %19 : vector<16x32xf32> to vector<16x32xbf16>
    %c0_15 = arith.constant 0 : index
    %c0_16 = arith.constant 0 : index
    %21 = vector.load %arg7[%c0_15, %c0_16] : memref<1x32xbf16, #tpu.memory_space<vmem>>, vector<1x32xbf16>
    %22 = vector.broadcast %21 : vector<1x32xbf16> to vector<16x32xbf16>
    %23 = arith.addf %20, %22 : vector<16x32xbf16>
    %cst_17 = arith.constant 0.000000e+00 : bf16
    %24 = vector.broadcast %cst_17 : bf16 to vector<16x32xbf16>
    %25 = arith.maximumf %23, %24 : vector<16x32xbf16>
    %c0_18 = arith.constant 0 : index
    %c0_19 = arith.constant 0 : index
    %26 = vector.load %arg8[%c0_18, %c0_19] : memref<1x32xbf16, #tpu.memory_space<vmem>>, vector<1x32xbf16>
    %cst_20 = arith.constant dense<0.000000e+00> : vector<1x16xf32>
    %27 = tpu.matmul %26, %25, %cst_20 {dimension_numbers = #tpu.dot_dimension_numbers<[1], [1], [0], [0], [0, 0, 1, 0], [], []>} : vector<1x32xbf16>, vector<16x32xbf16>, vector<1x16xf32> -> vector<1x16xf32>
    %c0_21 = arith.constant 0 : index
    %c0_22 = arith.constant 0 : index
    %28 = memref.load %arg9[%c0_21, %c0_22] : memref<1x1xf32, #tpu.memory_space<smem>>
    %29 = vector.broadcast %28 : f32 to vector<1x16xf32>
    %30 = arith.addf %27, %29 : vector<1x16xf32>
    %cst_23 = arith.constant 0.000000e+00 : f32
    %31 = vector.broadcast %cst_23 : f32 to vector<1x16xf32>
    %32 = arith.subf %31, %30 : vector<1x16xf32>
    %33 = math.exp %32 : vector<1x16xf32>
    %cst_24 = arith.constant 1.000000e+00 : f32
    %34 = vector.broadcast %cst_24 : f32 to vector<1x16xf32>
    %35 = arith.addf %34, %33 : vector<1x16xf32>
    %36 = tpu.reciprocal %35 {approx = true} : vector<1x16xf32> -> vector<1x16xf32>
    %c0_25 = arith.constant 0 : index
    %c0_26 = arith.constant 0 : index
    %37 = vector.load %arg10[%c0_25, %c0_26] : memref<1x16xf32, #tpu.memory_space<vmem>>, vector<1x16xf32>
    tpu.vector_store %arg10[%c0_25, %c0_26], %36 {strides = array<i32>} : memref<1x16xf32, #tpu.memory_space<vmem>>, vector<1x16xf32>,
    return
  }
  func.func @transform_0(%arg0: i32) -> (i32, i32) {
    %c0_i32 = arith.constant 0 : i32
    %c0_i32_0 = arith.constant 0 : i32
    return %arg0, %c0_i32 : i32, i32
  }
  func.func @transform_1(%arg0: i32) -> (i32, i32) {
    %c0_i32 = arith.constant 0 : i32
    %c0_i32_0 = arith.constant 0 : i32
    %c0_i32_1 = arith.constant 0 : i32
    return %c0_i32, %c0_i32_0 : i32, i32
  }
  func.func @transform_2(%arg0: i32) -> (i32, i32) {
    %c0_i32 = arith.constant 0 : i32
    %c0_i32_0 = arith.constant 0 : i32
    %c0_i32_1 = arith.constant 0 : i32
    return %c0_i32, %c0_i32_0 : i32, i32
  }
  func.func @transform_3(%arg0: i32) -> (i32, i32) {
    %c0_i32 = arith.constant 0 : i32
    %c0_i32_0 = arith.constant 0 : i32
    %c0_i32_1 = arith.constant 0 : i32
    return %c0_i32, %c0_i32_0 : i32, i32
  }
  func.func @transform_4(%arg0: i32) -> (i32, i32) {
    %c0_i32 = arith.constant 0 : i32
    %c0_i32_0 = arith.constant 0 : i32
    %c0_i32_1 = arith.constant 0 : i32
    return %c0_i32, %c0_i32_0 : i32, i32
  }
  func.func @transform_5(%arg0: i32) -> (i32, i32) {
    %c0_i32 = arith.constant 0 : i32
    %c0_i32_0 = arith.constant 0 : i32
    %c0_i32_1 = arith.constant 0 : i32
    return %c0_i32, %c0_i32_0 : i32, i32
  }
  func.func @transform_6(%arg0: i32) -> (i32, i32) {
    %c0_i32 = arith.constant 0 : i32
    %c0_i32_0 = arith.constant 0 : i32
    %c0_i32_1 = arith.constant 0 : i32
    return %c0_i32, %c0_i32_0 : i32, i32
  }
  func.func @transform_7(%arg0: i32) -> (i32, i32) {
    %c0_i32 = arith.constant 0 : i32
    %c0_i32_0 = arith.constant 0 : i32
    %c0_i32_1 = arith.constant 0 : i32
    return %c0_i32, %c0_i32_0 : i32, i32
  }
  func.func @transform_8(%arg0: i32) -> (i32, i32) {
    %c0_i32 = arith.constant 0 : i32
    %c0_i32_0 = arith.constant 0 : i32
    %c0_i32_1 = arith.constant 0 : i32
    return %c0_i32, %c0_i32_0 : i32, i32
  }
  func.func @transform_9(%arg0: i32) -> (i32, i32) {
    %c0_i32 = arith.constant 0 : i32
    %c0_i32_0 = arith.constant 0 : i32
    return %c0_i32, %arg0 : i32, i32
  }
}

</mosaic_0001>

<bundles_post_ra>
// kernel: tpu_custom_call.1
= control target key start
LH: loop header
LB: loop body
LE: loop exit
PB: predicated region body
PF: predicated region fallthrough
CT: control target
= control target key end

     0   :  { %vm49_vm0 = vcmask 1045504   ;;  %v505_v0 = vmov 0.0   ;;  %vm50_vm1 = vcmask 1046528   ;;  %v506_v3 = vmov 65535   ;;  %s645_s0 = inlined_call_operand.vmem [shape: f32[16,13], index: 0, kind: input, shape index: {}]   ;;  %s646_s1 = inlined_call_operand.vmem [shape: bf16[13,128], index: 1, kind: input, shape index: {}]   ;;  %s647_s2 = inlined_call_operand.vmem [shape: bf16[1,128], index: 2, kind: input, shape index: {}]   ;;  %s648_s3 = inlined_call_operand.vmem [shape: bf16[128,64], index: 3, kind: input, shape index: {}]   ;;  %s649_s4 = inlined_call_operand.vmem [shape: bf16[1,64], index: 4, kind: input, shape index: {}]   ;;  %s650_s5 = inlined_call_operand.vmem [shape: bf16[64,32], index: 5, kind: input, shape index: {}]   ;;  %s651_s6 = inlined_call_operand.vmem [shape: bf16[1,32], index: 6, kind: input, shape index: {}]   ;;  %s652_s7 = inlined_call_operand.vmem [shape: bf16[1,32], index: 7, kind: input, shape index: {}]   ;;  %s653_s8 = inlined_call_operand.<no memory space> [shape: f32[1,1], index: 8, kind: input, shape index: {}]   ;;  %s654_s9 = inlined_call_operand.hbm [shape: f32[1,16], index: 9, kind: output, shape index: {}]  }
   0x1   :  { %417 = vmatprep.subr.bf16.mxu0 %v505_v0  ;;  %v466_v1 = vld [vmem:[%s646_s1] sm:$0x7f]   ;;  %423 = vmatprep.subr.bf16.mxu1 %v505_v0  ;;  %v51_v4 = vsel %vm49_vm0, 4294967295, %v506_v3  ;;  %vm507_vm2 = vmmov 0   ;;  %v36_v5 = vld [vmem:[%s645_s0 + $0x8] sm:$0xff]  ;;  %v467_v6 = vld [vmem:[%s648_s3 + $0x38] sm:$0xff]  }
   0x2   :  { %v35_v2 = vld [vmem:[%s645_s0] sm:$0xff]  ;;  %419 = vmatprep.mubr.msk.bf16.mxu0 %vm507_vm2, %v505_v0  ;;  %439 = vmatprep.mubr.msk.bf16.mxu1 %vm507_vm2, %v505_v0  ;;  %v52_v7 = vsel %vm50_vm1, %v51_v4, 0  ;;  %v468_v8 = vld [vmem:[%s648_s3 + $0x30] sm:$0xff]   ;;  %vm45_vm3 = vcmask 105472   ;;  %v469_v11 = vld [vmem:[%s648_s3 + $0x28] sm:$0xff]  }
   0x3   :  { %v54_v9 = vand.u32 %v466_v1, %v52_v7  ;;  %424 = vmatpush3.bf16.msra.mxu1 %v467_v6  ;;  %v37_v10 = vpack.c.bf16 %v36_v5, %v35_v2  ;;  %v470_v12 = vld [vmem:[%s648_s3 + $0x20] sm:$0xff]  }
   0x4   :  { %425 = vmatprep.subr.bf16.mxu1 %v505_v0 }
   0x5   :  { %418 = vmatpush3.bf16.msra.mxu0 %v54_v9 }
   0x6   :  { %443 = vmatprep.subr.bf16.mxu0 %v505_v0 }
   0x7   :  { %426 = vmatpush3.bf16.msra.mxu1 %v468_v8 }
   0x8   :  { %420 = vmatmul.mubr.msk.bf16.vlgmr.msra.gmra.mxu0 %vm45_vm3, %v37_v10  ;;  %427 = vmatprep.subr.bf16.mxu1 %v505_v0 }
   0x9   :  { %451 = vmatprep.mubr.msk.bf16.mxu0 %vm507_vm2, %v505_v0 }
   0xb   :  { %428 = vmatpush3.bf16.msra.mxu1 %v469_v11 }
   0xc   :  { %15 = vsyncpa [#allocation4], 0  ;;  %429 = vmatprep.subr.bf16.mxu1 %v505_v0  ;;  %v471_v13 = vld [vmem:[%s648_s3 + $0x18] sm:$0xff]   ;;  %v472_v14 = vld [vmem:[%s648_s3 + $0x10] sm:$0xff]   ;;  %v102_v18 = vlaneseq  ;;  %v508_v30 = vmov 0   ;;  %vm256_vm4 = vcmask 523264   ;;  %v314_v57 = vstv %s653_s8 }
   0xd   :  { %v473_v15 = vld [vmem:[%s648_s3 + $0x8] sm:$0xff]   ;;  %v474_v16 = vld [vmem:[%s648_s3] sm:$0xff]   ;;  %v475_v17 = vld [vmem:[%s650_s5 + $0x18] sm:$0xff]   ;;  %vm315_vm5 = vcmask 261120   ;;  %vm367_vm6 = vcmask 122880  }
   0xe   :  { %444 = vmatpush3.bf16.msra.mxu0 %v475_v17  ;;  %v103_v19 = vshrl.u32 %v102_v18, 7  ;;  %v98_v20 = vld [vmem:[%s647_s2] sm:$0x1]  ;;  %v476_v32 = vld [vmem:[%s650_s5 + $0x10] sm:$0xff]   ;;  %v477_v33 = vld [vmem:[%s650_s5 + $0x8] sm:$0xff]  }
   0xf   :  { %430 = vmatpush3.bf16.msra.mxu1 %v470_v12  ;;  %445 = vmatprep.subr.bf16.mxu0 %v505_v0  ;;  %v100_v21 = vpack.i.b16 %v98_v20, %v98_v20  ;;  %v478_v34 = vld [vmem:[%s650_s5] sm:$0xff]  }
  0x10   :  { %431 = vmatprep.subr.bf16.mxu1 %v505_v0  ;;  %v104_v22 = vsub.s32 0, %v103_v19  ;;  %v214_v35 = vld [vmem:[%s649_s4] sm:$0x1] }
  0x11   :  { %v216_v36 = vpack.i.b16 %v214_v35, %v214_v35  ;;  %v302_v45 = vld [vmem:[%s651_s6] sm:$0x1]  ;;  %s509_s6 = smov [#allocation3]  }
  0x12   :  { %v105_v25 = vrot.slane %v100_v21, %v104_v22  ;;  %446 = vmatpush3.bf16.msra.mxu0 %v476_v32  ;;  %v304_v46 = vpack.i.b16 %v302_v45, %v302_v45  ;;  %v312_v56 = vld [vmem:[%s652_s7] sm:$0x1]  ;;  %s375_s20 = sshll.u32 %s509_s6, 4  ;;  %s376_s20 = int_to_ptr.vmem [resolvable:$true] %s375_s20 }
  0x13   :  { %432 = vmatpush3.bf16.msra.mxu1 %v471_v13  ;;  %447 = vmatprep.subr.bf16.mxu0 %v505_v0  ;;  %v221_v39 = vrot.slane %v216_v36, %v104_v22  ;;  %s483_s7 = scalar_lea.vmem %s376_s20, 16  ;;  %s487_s8 = scalar_lea.vmem %s376_s20, 32 }
  0x14   :  { %433 = vmatprep.subr.bf16.mxu1 %v505_v0  ;;  %v309_v49 = vrot.slane %v304_v46, %v104_v22  ;;  %p484_p0 = scmp.ne.s32.totalorder %s376_s20, %s483_s7  ;;  %p488_p1 = scmp.lt.s32.totalorder %s376_s20, %s376_s20 }
  0x15   :  { %p489_p2 = scmp.lt.s32.totalorder %s487_s8, %s483_s7 }
  0x16   :  { %448 = vmatpush3.bf16.msra.mxu0 %v477_v33 }
  0x17   :  { %434 = vmatpush3.bf16.msra.mxu1 %v472_v14  ;;  %449 = vmatprep.subr.bf16.mxu0 %v505_v0  ;;  %p490_p3 = por %p489_p2, %p488_p1 }
  0x18   :  { %435 = vmatprep.subr.bf16.mxu1 %v505_v0 }
  0x19   :  { %p491_p4 = pnand %p490_p3, %p484_p0 }
  0x1a   :  { %450 = vmatpush3.bf16.msra.mxu0 %v478_v34 }
  0x1b   :  { %436 = vmatpush3.bf16.msra.mxu1 %v473_v15  ;;  %455 = vmatprep.subr.bf16.mxu0 %v505_v0 }
  0x1c   :  { %437 = vmatprep.subr.bf16.mxu1 %v505_v0 }
  0x1f   :  { %438 = vmatpush3.bf16.msra.mxu1 %v474_v16 }
  0xc8   :  { %v90_v23 = vpop.f32.mrf.mxu0 }
  0xca   :  { %v421_v24 = vpop.f32.mrf.mxu0 }
  0xcc   :  { %v93_v26 = vpop.f32.mrf.mxu0 }
  0xcd   :  { %v97_v27 = vpack.c.bf16 %v93_v26, %v90_v23 }
  0xce   :  { %v422_v28 = vpop.f32.mrf.mxu0 }
  0xcf   :  { %v106_v29 = vadd.bf16 %v105_v25, %v97_v27 }
  0xd1   :  { %v107_v31 = vmax.bf16 %v508_v30, %v106_v29 }
  0xd3   :  { %440 = vmatmul.mubr.bf16.vlgmr.msra.gmra.mxu1 %v107_v31 }
 0x193   :  { %v206_v37 = vpop.f32.mrf.mxu1 }
 0x195   :  { %v441_v38 = vpop.f32.mrf.mxu1 }
 0x197   :  { %v209_v40 = vpop.f32.mrf.mxu1 }
 0x198   :  { %v213_v41 = vpack.c.bf16 %v209_v40, %v206_v37 }
 0x199   :  { %v442_v42 = vpop.f32.mrf.mxu1 }
 0x19a   :  { %v222_v43 = vadd.bf16 %v221_v39, %v213_v41 }
 0x19c   :  { %v223_v44 = vmax.bf16 %v508_v30, %v222_v43 }
 0x19e   :  { %452 = vmatmul.mubr.msk.bf16.vlgmr.msra.gmra.mxu0 %vm256_vm4, %v223_v44 }
 0x19f   :  { %457 = vmatprep.mubr.msk.bf16.mxu0 %vm507_vm2, %v505_v0 }
 0x25e   :  { %v294_v47 = vpop.f32.mrf.mxu0 }
 0x260   :  { %v453_v48 = vpop.f32.mrf.mxu0 }
 0x262   :  { %v297_v50 = vpop.f32.mrf.mxu0 }
 0x263   :  { %v301_v51 = vpack.c.bf16 %v297_v50, %v294_v47 }
 0x264   :  { %v454_v52 = vpop.f32.mrf.mxu0 }
 0x265   :  { %v310_v53 = vadd.bf16 %v309_v49, %v301_v51 }
 0x267   :  { %v311_v54 = vmax.bf16 %v508_v30, %v310_v53 }
 0x269   :  { %v320_v55 = vsel %vm315_vm5, %v311_v54, 0 }
 0x26a   :  { %456 = vmatpush3.bf16.xpose.msra.mxu0 %v320_v55 }
 0x271   :  { %458 = vmatmul.mubr.msk.bf16.vlgmr.msra.gmra.mxu0 %vm315_vm5, %v312_v56 }
 0x331   :  { %v356_v58 = vpop.f32.mrf.mxu0 }
 0x332   :  { %v357_v59 = vadd.f32 %v356_v58, %v314_v57 }
 0x333   :  { %v459_v60 = vpop.f32.mrf.mxu0 }
 0x334   :  { %v362_v61 = vsub.f32 0.0, %v357_v59 }
 0x335   :  { %v359_v62 = vpop.f32.mrf.mxu0 }
 0x336   :  { %v363_v63 = vmul.f32 1.442695, %v362_v61 }
 0x337   :  { %v460_v0 = vpop.f32.mrf.mxu0 }
 0x338   :  { %479 = vpow2.f32 %v363_v63 }
 0x345   :  { %v480_v1 = vpop.eup %479 }
 0x346   :  { %v365_v2 = vadd.f32 1.0, %v480_v1 }
 0x348   :  { %481 = vrcp.f32 %v365_v2 }
 0x355   :  { %v482_v3 = vpop.eup %481 }
 0x356   :  { %368 = vst.msk [vmem:[#allocation3] sm:$0x1] %vm367_vm6, %v482_v3 }
 0x357   :  { %494 = shalt.err (!%p491_p4)
}
 0x358   :  { %378 = dma.vmem_to_hbm [thread:$0]  %s376_s20, 16, %s654_s9, [#allocation4]  }
 0x359   :  { %503 = dma.done.wait [#allocation4], 16  }
 0x35a   :  { %504 = vsyncadd [#allocation4], 4294967280 }
 0x35b   :  { %382 = vsyncpa [#allocation4], 1 }

</bundles_post_ra>
